<compile_context>
chip_gen: v6e
topology: v6e:2x2x1
jax: 0.10.0
libtpu: 0.0.40
codegen_flags: <defaults>
</compile_context>

<pallas_src>
import math

import jax
import jax.numpy as jnp
from jax.experimental import pallas as pl
from jax.experimental.pallas import tpu as pltpu

_LANES = 128
_SUBLANES = 8


def _round_up(x, m):
    return (x + m - 1) // m * m


def _gelu(x, approximate=False):
    if approximate:
        # tanh approximation: exp/tanh go to the EUP slot (frees VALU); numerics differ
        # slightly from torch.nn.GELU(approximate='none').
        return jax.nn.gelu(x, approximate=True)
    # exact erf form: matches torch.nn.GELU() default.
    return 0.5 * x * (1.0 + jax.lax.erf(x * (1.0 / math.sqrt(2.0))))


def _masked_layernorm(x, gamma, beta, true_dim, eps):
    """LayerNorm over the last dim where only the first `true_dim` lanes are real.

    Assumes the padded lanes of `x`, `gamma`, `beta` are zero, so the padded lanes
    of the result stay zero as well.
    """
    dp = x.shape[-1]
    inv_d = 1.0 / float(true_dim)
    mu = jnp.sum(x, axis=-1, keepdims=True) * inv_d
    xc = x - mu
    if true_dim != dp:
        mask = jax.lax.broadcasted_iota(jnp.int32, (1, dp), 1) < true_dim
        xc = jnp.where(mask, xc, 0.0)
    var = jnp.sum(xc * xc, axis=-1, keepdims=True) * inv_d
    return xc * jax.lax.rsqrt(var + eps) * gamma + beta


def _make_projector_kernel(num_layers, input_dim, proj_dim, eps=1e-5, approx_gelu=False):
    """Fuses LN -> (Linear+GELU)*num_layers -> LN for one token tile."""

    def kernel(*refs):
        x_ref = refs[0]
        g1_ref, b1_ref = refs[1], refs[2]
        layer_refs = refs[3:3 + 2 * num_layers]          # (w0, b0, w1, b1, ...)
        g2_ref, b2_ref = refs[3 + 2 * num_layers], refs[4 + 2 * num_layers]
        o_ref = refs[5 + 2 * num_layers]

        x = x_ref[...].astype(jnp.float32)

        # norm1 (LayerNorm over input_dim, lane-masked against feature padding)
        h = _masked_layernorm(x, g1_ref[...], b1_ref[...], input_dim, eps)

        # projector: Dropout (identity in eval) + Linear + GELU per layer.
        for li in range(num_layers):
            w = layer_refs[2 * li][...]              # (K_pad, P_pad), bf16 (or f32)
            b = layer_refs[2 * li + 1][...]          # (1, P_pad), f32
            h = jnp.dot(h.astype(w.dtype), w, preferred_element_type=jnp.float32) + b
            h = _gelu(h, approximate=approx_gelu)    # last layer activation is GELU too

        # norm2 (LayerNorm over proj_dim)
        o_ref[...] = _masked_layernorm(h, g2_ref[...], b2_ref[...], proj_dim,
                                       eps).astype(o_ref.dtype)

    return kernel


def projector_forward(x, params, *, tile_n: int = 256,
                      use_bf16_matmul: bool = True, approx_gelu: bool = False):
    """x: [B, S, input_dim] float32.  Returns [B, S, proj_dim] float32."""
    gamma1, beta1, layers, gamma2, beta2 = (
        params["gamma1"], params["beta1"], params["layers"],
        params["gamma2"], params["beta2"],
    )
    num_layers = len(layers)
    B, S, din = x.shape
    pdim = layers[-1][0].shape[1]
    n_tokens = B * S

    dpad = _round_up(din, _LANES)     # lane-dense input features
    ppad = _round_up(pdim, _LANES)    # lane-dense output features

    # Token tile: large enough to fill the MXU and amortize per-grid-step overhead,
    # clamped for tiny problems.  Zero-padding of N removes any divisibility constraint.
    tile_n = _round_up(max(_SUBLANES, min(tile_n, _round_up(n_tokens, _SUBLANES))),
                       _SUBLANES)
    n_pad = _round_up(n_tokens, tile_n)

    w_dtype = jnp.bfloat16 if use_bf16_matmul else jnp.float32

    x2 = jnp.pad(x.reshape(n_tokens, din).astype(jnp.float32),
                 ((0, n_pad - n_tokens), (0, dpad - din)))

    def pad_row(v, dp):
        v = v.reshape(1, -1).astype(jnp.float32)
        return jnp.pad(v, ((0, 0), (0, dp - v.shape[-1])))

    def pad_w(w, kp, np_):
        wp = jnp.zeros((kp, np_), w_dtype)
        return wp.at[:w.shape[0], :w.shape[1]].set(w.astype(w_dtype))

    weight_ops = []
    for li, (w, b) in enumerate(layers):
        kp = dpad if li == 0 else ppad
        weight_ops.append((pad_w(w, kp, ppad), pad_row(b, ppad)))

    g1p, b1p = pad_row(gamma1, dpad), pad_row(beta1, dpad)
    g2p, b2p = pad_row(gamma2, ppad), pad_row(beta2, ppad)

    operands = [x2, g1p, b1p]
    for wp, bp in weight_ops:
        operands += [wp, bp]
    operands += [g2p, b2p]

    # Explicit scoped-VMEM budget: resident params, double-buffered I/O tiles,
    # f32 intermediates, plus headroom.
    param_bytes = sum(int(a.size) * a.dtype.itemsize for a in operands[1:])
    io_bytes = 2 * tile_n * (dpad + ppad) * 4
    scratch_bytes = 4 * tile_n * max(dpad, ppad) * 4
    vmem_limit = int(min(100 * 1024 * 1024,
                         max(32 * 1024 * 1024,
                             2 * (param_bytes + io_bytes) + scratch_bytes)))

    kernel = _make_projector_kernel(num_layers, din, pdim, approx_gelu=approx_gelu)
    grid = (n_pad // tile_n,)
    out_shape = jax.ShapeDtypeStruct((n_pad, ppad), jnp.float32)

    # Constant-index operands (weights/biases/gamma/beta) map every grid step to the
    # same block; the pipeline fetches them once and keeps them resident.
    def const_spec(shape):
        return pl.BlockSpec(shape, lambda i: (0, 0))

    in_specs = [pl.BlockSpec((tile_n, dpad), lambda i: (i, 0)),
                const_spec((1, dpad)), const_spec((1, dpad))]
    for wp, bp in weight_ops:
        in_specs += [const_spec(wp.shape), const_spec(bp.shape)]
    in_specs += [const_spec((1, ppad)), const_spec((1, ppad))]

    out = pl.pallas_call(
        kernel,
        out_shape=out_shape,
        grid=grid,
        in_specs=in_specs,
        out_specs=pl.BlockSpec((tile_n, ppad), lambda i: (i, 0)),
        compiler_params=pltpu.CompilerParams(
            dimension_semantics=("parallel",),
            vmem_limit_bytes=vmem_limit,
        ),
    )(*operands)

    return out[:n_tokens, :pdim].reshape(B, S, pdim)


def projector_reference(x, params, eps=1e-5):
    """Pure-JAX f32 reference matching the PyTorch module in eval mode."""
    def ln(v, g, b):
        mu = jnp.mean(v, -1, keepdims=True)
        var = jnp.mean(jnp.square(v - mu), -1, keepdims=True)
        return (v - mu) / jnp.sqrt(var + eps) * g + b

    h = ln(x, params["gamma1"], params["beta1"])
    for w, b in params["layers"]:
        h = jnp.dot(h, w) + b
        h = 0.5 * h * (1.0 + jax.lax.erf(h / math.sqrt(2.0)))
    return ln(h, params["gamma2"], params["beta2"])


def init_projector_params(key, proj_layers: int, input_dim: int, proj_dim: int):
    """Deterministic synthetic parameters matching Projector.__init__ shapes."""
    keys = jax.random.split(key, 2 * proj_layers)
    layers = []
    for i in range(proj_layers):
        din = input_dim if i == 0 else proj_dim
        bound = 1.0 / math.sqrt(din)  # nn.Linear default init range
        w = jax.random.uniform(keys[2 * i], (din, proj_dim), jnp.float32, -bound, bound)
        b = jax.random.uniform(keys[2 * i + 1], (proj_dim,), jnp.float32, -bound, bound)
        layers.append((w, b))
    return {
        "gamma1": jnp.ones((input_dim,), jnp.float32),
        "beta1": jnp.zeros((input_dim,), jnp.float32),
        "layers": layers,
        "gamma2": jnp.ones((proj_dim,), jnp.float32),
        "beta2": jnp.zeros((proj_dim,), jnp.float32),
    }


if __name__ == "__main__":
    B, S = 2, 8
    INPUT_DIM, PROJ_DIM, PROJ_LAYERS = 32, 32, 2

    root = jax.random.PRNGKey(0)
    k_x, k_p = jax.random.split(root)
    x = jax.random.normal(k_x, (B, S, INPUT_DIM), jnp.float32)
    params = init_projector_params(k_p, PROJ_LAYERS, INPUT_DIM, PROJ_DIM)

    y = projector_forward(x, params)          # tile_n auto-clamps for this tiny demo
    jax.block_until_ready(y)

    assert y.shape == (B, S, PROJ_DIM) and y.dtype == jnp.float32

    y_ref = projector_reference(x, params)
    max_err = float(jnp.max(jnp.abs(y - y_ref)))
    # bf16 MXU inputs with f32 accumulation -> small tolerance vs f32 reference.
    assert max_err < 5e-2, f"max abs err {max_err}"

    print("KERNEL_OK")
</pallas_src>

<mosaic_0001>
module attributes {stable_mosaic.version = 11 : i64} {
  func.func @kernel(%arg0: i32, %arg1: memref<16x128xf32, #tpu.memory_space<vmem>>, %arg2: memref<1x128xf32, #tpu.memory_space<vmem>>, %arg3: memref<1x128xf32, #tpu.memory_space<vmem>>, %arg4: memref<128x128xbf16, #tpu.memory_space<vmem>>, %arg5: memref<1x128xf32, #tpu.memory_space<vmem>>, %arg6: memref<128x128xbf16, #tpu.memory_space<vmem>>, %arg7: memref<1x128xf32, #tpu.memory_space<vmem>>, %arg8: memref<1x128xf32, #tpu.memory_space<vmem>>, %arg9: memref<1x128xf32, #tpu.memory_space<vmem>>, %arg10: memref<16x128xf32, #tpu.memory_space<vmem>>) attributes {dimension_semantics = [#tpu.dimension_semantics<parallel>], iteration_bounds = array<i64: 1>, scalar_prefetch = 0 : i64, scratch_operands = 0 : i64, tpu.core_type = #tpu.core_type<tc>, window_params = [{transform_indices = @transform_0, window_bounds = array<i64: 16, 128>}, {pipeline_mode = #tpu.pipeline_mode<synchronous>, transform_indices = @transform_1, window_bounds = array<i64: 1, 128>}, {pipeline_mode = #tpu.pipeline_mode<synchronous>, transform_indices = @transform_2, window_bounds = array<i64: 1, 128>}, {pipeline_mode = #tpu.pipeline_mode<synchronous>, transform_indices = @transform_3, window_bounds = array<i64: 128, 128>}, {pipeline_mode = #tpu.pipeline_mode<synchronous>, transform_indices = @transform_4, window_bounds = array<i64: 1, 128>}, {pipeline_mode = #tpu.pipeline_mode<synchronous>, transform_indices = @transform_5, window_bounds = array<i64: 128, 128>}, {pipeline_mode = #tpu.pipeline_mode<synchronous>, transform_indices = @transform_6, window_bounds = array<i64: 1, 128>}, {pipeline_mode = #tpu.pipeline_mode<synchronous>, transform_indices = @transform_7, window_bounds = array<i64: 1, 128>}, {pipeline_mode = #tpu.pipeline_mode<synchronous>, transform_indices = @transform_8, window_bounds = array<i64: 1, 128>}, {transform_indices = @transform_9, window_bounds = array<i64: 16, 128>}]} {
    %c0 = arith.constant 0 : index
    %c0_0 = arith.constant 0 : index
    %0 = vector.load %arg1[%c0, %c0_0] : memref<16x128xf32, #tpu.memory_space<vmem>>, vector<16x128xf32>
    %c0_1 = arith.constant 0 : index
    %c0_2 = arith.constant 0 : index
    %1 = vector.load %arg2[%c0_1, %c0_2] : memref<1x128xf32, #tpu.memory_space<vmem>>, vector<1x128xf32>
    %c0_3 = arith.constant 0 : index
    %c0_4 = arith.constant 0 : index
    %2 = vector.load %arg3[%c0_3, %c0_4] : memref<1x128xf32, #tpu.memory_space<vmem>>, vector<1x128xf32>
    %cst = arith.constant dense<0.000000e+00> : vector<16xf32>
    %3 = vector.multi_reduction <add>, %0, %cst [1] : vector<16x128xf32> to vector<16xf32>
    %4 = vector.shape_cast %3 : vector<16xf32> to vector<16x1xf32>
    %cst_5 = arith.constant 3.125000e-02 : f32
    %5 = vector.broadcast %cst_5 : f32 to vector<16x1xf32>
    %6 = arith.mulf %4, %5 : vector<16x1xf32>
    %7 = vector.broadcast %6 : vector<16x1xf32> to vector<16x128xf32>
    %8 = arith.subf %0, %7 : vector<16x128xf32>
    %9 = tpu.iota {dimensions = array<i32: 1>} : vector<1x128xi32>
    %c32_i32 = arith.constant 32 : i32
    %10 = vector.broadcast %c32_i32 : i32 to vector<1x128xi32>
    %11 = arith.cmpi slt, %9, %10 : vector<1x128xi32>
    %cst_6 = arith.constant 0.000000e+00 : f32
    %12 = vector.shape_cast %11 : vector<1x128xi1> to vector<1x128xi1>
    %13 = vector.broadcast %12 : vector<1x128xi1> to vector<16x128xi1>
    %14 = vector.broadcast %cst_6 : f32 to vector<16x128xf32>
    %15 = arith.select %13, %8, %14 : vector<16x128xi1>, vector<16x128xf32>
    %16 = arith.mulf %15, %15 : vector<16x128xf32>
    %cst_7 = arith.constant dense<0.000000e+00> : vector<16xf32>
    %17 = vector.multi_reduction <add>, %16, %cst_7 [1] : vector<16x128xf32> to vector<16xf32>
    %18 = vector.shape_cast %17 : vector<16xf32> to vector<16x1xf32>
    %cst_8 = arith.constant 3.125000e-02 : f32
    %19 = vector.broadcast %cst_8 : f32 to vector<16x1xf32>
    %20 = arith.mulf %18, %19 : vector<16x1xf32>
    %cst_9 = arith.constant 9.99999974E-6 : f32
    %21 = vector.broadcast %cst_9 : f32 to vector<16x1xf32>
    %22 = arith.addf %20, %21 : vector<16x1xf32>
    %23 = math.rsqrt %22 : vector<16x1xf32>
    %24 = vector.broadcast %23 : vector<16x1xf32> to vector<16x128xf32>
    %25 = arith.mulf %15, %24 : vector<16x128xf32>
    %26 = vector.broadcast %1 : vector<1x128xf32> to vector<16x128xf32>
    %27 = arith.mulf %25, %26 : vector<16x128xf32>
    %28 = vector.broadcast %2 : vector<1x128xf32> to vector<16x128xf32>
    %29 = arith.addf %27, %28 : vector<16x128xf32>
    %c0_10 = arith.constant 0 : index
    %c0_11 = arith.constant 0 : index
    %30 = vector.load %arg4[%c0_10, %c0_11] : memref<128x128xbf16, #tpu.memory_space<vmem>>, vector<128x128xbf16>
    %c0_12 = arith.constant 0 : index
    %c0_13 = arith.constant 0 : index
    %31 = vector.load %arg5[%c0_12, %c0_13] : memref<1x128xf32, #tpu.memory_space<vmem>>, vector<1x128xf32>
    %32 = arith.truncf %29 : vector<16x128xf32> to vector<16x128xbf16>
    %cst_14 = arith.constant dense<0.000000e+00> : vector<16x128xf32>
    %33 = tpu.matmul %32, %30, %cst_14 {dimension_numbers = #tpu.dot_dimension_numbers<[1], [0], [0], [1], [0, 0, 1, 1], [], []>} : vector<16x128xbf16>, vector<128x128xbf16>, vector<16x128xf32> -> vector<16x128xf32>
    %34 = vector.broadcast %31 : vector<1x128xf32> to vector<16x128xf32>
    %35 = arith.addf %33, %34 : vector<16x128xf32>
    %cst_15 = arith.constant 5.000000e-01 : f32
    %36 = vector.broadcast %cst_15 : f32 to vector<16x128xf32>
    %37 = arith.mulf %36, %35 : vector<16x128xf32>
    %cst_16 = arith.constant 0.707106769 : f32
    %38 = vector.broadcast %cst_16 : f32 to vector<16x128xf32>
    %39 = arith.mulf %35, %38 : vector<16x128xf32>
    %40 = math.erf %39 : vector<16x128xf32>
    %cst_17 = arith.constant 1.000000e+00 : f32
    %41 = vector.broadcast %cst_17 : f32 to vector<16x128xf32>
    %42 = arith.addf %41, %40 : vector<16x128xf32>
    %43 = arith.mulf %37, %42 : vector<16x128xf32>
    %c0_18 = arith.constant 0 : index
    %c0_19 = arith.constant 0 : index
    %44 = vector.load %arg6[%c0_18, %c0_19] : memref<128x128xbf16, #tpu.memory_space<vmem>>, vector<128x128xbf16>
    %c0_20 = arith.constant 0 : index
    %c0_21 = arith.constant 0 : index
    %45 = vector.load %arg7[%c0_20, %c0_21] : memref<1x128xf32, #tpu.memory_space<vmem>>, vector<1x128xf32>
    %46 = arith.truncf %43 : vector<16x128xf32> to vector<16x128xbf16>
    %cst_22 = arith.constant dense<0.000000e+00> : vector<16x128xf32>
    %47 = tpu.matmul %46, %44, %cst_22 {dimension_numbers = #tpu.dot_dimension_numbers<[1], [0], [0], [1], [0, 0, 1, 1], [], []>} : vector<16x128xbf16>, vector<128x128xbf16>, vector<16x128xf32> -> vector<16x128xf32>
    %48 = vector.broadcast %45 : vector<1x128xf32> to vector<16x128xf32>
    %49 = arith.addf %47, %48 : vector<16x128xf32>
    %cst_23 = arith.constant 5.000000e-01 : f32
    %50 = vector.broadcast %cst_23 : f32 to vector<16x128xf32>
    %51 = arith.mulf %50, %49 : vector<16x128xf32>
    %cst_24 = arith.constant 0.707106769 : f32
    %52 = vector.broadcast %cst_24 : f32 to vector<16x128xf32>
    %53 = arith.mulf %49, %52 : vector<16x128xf32>
    %54 = math.erf %53 : vector<16x128xf32>
    %cst_25 = arith.constant 1.000000e+00 : f32
    %55 = vector.broadcast %cst_25 : f32 to vector<16x128xf32>
    %56 = arith.addf %55, %54 : vector<16x128xf32>
    %57 = arith.mulf %51, %56 : vector<16x128xf32>
    %c0_26 = arith.constant 0 : index
    %c0_27 = arith.constant 0 : index
    %58 = vector.load %arg8[%c0_26, %c0_27] : memref<1x128xf32, #tpu.memory_space<vmem>>, vector<1x128xf32>
    %c0_28 = arith.constant 0 : index
    %c0_29 = arith.constant 0 : index
    %59 = vector.load %arg9[%c0_28, %c0_29] : memref<1x128xf32, #tpu.memory_space<vmem>>, vector<1x128xf32>
    %cst_30 = arith.constant dense<0.000000e+00> : vector<16xf32>
    %60 = vector.multi_reduction <add>, %57, %cst_30 [1] : vector<16x128xf32> to vector<16xf32>
    %61 = vector.shape_cast %60 : vector<16xf32> to vector<16x1xf32>
    %cst_31 = arith.constant 3.125000e-02 : f32
    %62 = vector.broadcast %cst_31 : f32 to vector<16x1xf32>
    %63 = arith.mulf %61, %62 : vector<16x1xf32>
    %64 = vector.broadcast %63 : vector<16x1xf32> to vector<16x128xf32>
    %65 = arith.subf %57, %64 : vector<16x128xf32>
    %66 = tpu.iota {dimensions = array<i32: 1>} : vector<1x128xi32>
    %c32_i32_32 = arith.constant 32 : i32
    %67 = vector.broadcast %c32_i32_32 : i32 to vector<1x128xi32>
    %68 = arith.cmpi slt, %66, %67 : vector<1x128xi32>
    %cst_33 = arith.constant 0.000000e+00 : f32
    %69 = vector.shape_cast %68 : vector<1x128xi1> to vector<1x128xi1>
    %70 = vector.broadcast %69 : vector<1x128xi1> to vector<16x128xi1>
    %71 = vector.broadcast %cst_33 : f32 to vector<16x128xf32>
    %72 = arith.select %70, %65, %71 : vector<16x128xi1>, vector<16x128xf32>
    %73 = arith.mulf %72, %72 : vector<16x128xf32>
    %cst_34 = arith.constant dense<0.000000e+00> : vector<16xf32>
    %74 = vector.multi_reduction <add>, %73, %cst_34 [1] : vector<16x128xf32> to vector<16xf32>
    %75 = vector.shape_cast %74 : vector<16xf32> to vector<16x1xf32>
    %cst_35 = arith.constant 3.125000e-02 : f32
    %76 = vector.broadcast %cst_35 : f32 to vector<16x1xf32>
    %77 = arith.mulf %75, %76 : vector<16x1xf32>
    %cst_36 = arith.constant 9.99999974E-6 : f32
    %78 = vector.broadcast %cst_36 : f32 to vector<16x1xf32>
    %79 = arith.addf %77, %78 : vector<16x1xf32>
    %80 = math.rsqrt %79 : vector<16x1xf32>
    %81 = vector.broadcast %80 : vector<16x1xf32> to vector<16x128xf32>
    %82 = arith.mulf %72, %81 : vector<16x128xf32>
    %83 = vector.broadcast %58 : vector<1x128xf32> to vector<16x128xf32>
    %84 = arith.mulf %82, %83 : vector<16x128xf32>
    %85 = vector.broadcast %59 : vector<1x128xf32> to vector<16x128xf32>
    %86 = arith.addf %84, %85 : vector<16x128xf32>
    %c0_37 = arith.constant 0 : index
    %c0_38 = arith.constant 0 : index
    %87 = vector.load %arg10[%c0_37, %c0_38] : memref<16x128xf32, #tpu.memory_space<vmem>>, vector<16x128xf32>
    tpu.vector_store %arg10[%c0_37, %c0_38], %86 {strides = array<i32>} : memref<16x128xf32, #tpu.memory_space<vmem>>, vector<16x128xf32>,
    return
  }
  func.func @transform_0(%arg0: i32) -> (i32, i32) {
    %c0_i32 = arith.constant 0 : i32
    %c0_i32_0 = arith.constant 0 : i32
    return %arg0, %c0_i32 : i32, i32
  }
  func.func @transform_1(%arg0: i32) -> (i32, i32) {
    %c0_i32 = arith.constant 0 : i32
    %c0_i32_0 = arith.constant 0 : i32
    %c0_i32_1 = arith.constant 0 : i32
    return %c0_i32, %c0_i32_0 : i32, i32
  }
  func.func @transform_2(%arg0: i32) -> (i32, i32) {
    %c0_i32 = arith.constant 0 : i32
    %c0_i32_0 = arith.constant 0 : i32
    %c0_i32_1 = arith.constant 0 : i32
    return %c0_i32, %c0_i32_0 : i32, i32
  }
  func.func @transform_3(%arg0: i32) -> (i32, i32) {
    %c0_i32 = arith.constant 0 : i32
    %c0_i32_0 = arith.constant 0 : i32
    %c0_i32_1 = arith.constant 0 : i32
    return %c0_i32, %c0_i32_0 : i32, i32
  }
  func.func @transform_4(%arg0: i32) -> (i32, i32) {
    %c0_i32 = arith.constant 0 : i32
    %c0_i32_0 = arith.constant 0 : i32
    %c0_i32_1 = arith.constant 0 : i32
    return %c0_i32, %c0_i32_0 : i32, i32
  }
  func.func @transform_5(%arg0: i32) -> (i32, i32) {
    %c0_i32 = arith.constant 0 : i32
    %c0_i32_0 = arith.constant 0 : i32
    %c0_i32_1 = arith.constant 0 : i32
    return %c0_i32, %c0_i32_0 : i32, i32
  }
  func.func @transform_6(%arg0: i32) -> (i32, i32) {
    %c0_i32 = arith.constant 0 : i32
    %c0_i32_0 = arith.constant 0 : i32
    %c0_i32_1 = arith.constant 0 : i32
    return %c0_i32, %c0_i32_0 : i32, i32
  }
  func.func @transform_7(%arg0: i32) -> (i32, i32) {
    %c0_i32 = arith.constant 0 : i32
    %c0_i32_0 = arith.constant 0 : i32
    %c0_i32_1 = arith.constant 0 : i32
    return %c0_i32, %c0_i32_0 : i32, i32
  }
  func.func @transform_8(%arg0: i32) -> (i32, i32) {
    %c0_i32 = arith.constant 0 : i32
    %c0_i32_0 = arith.constant 0 : i32
    %c0_i32_1 = arith.constant 0 : i32
    return %c0_i32, %c0_i32_0 : i32, i32
  }
  func.func @transform_9(%arg0: i32) -> (i32, i32) {
    %c0_i32 = arith.constant 0 : i32
    %c0_i32_0 = arith.constant 0 : i32
    return %arg0, %c0_i32 : i32, i32
  }
}

</mosaic_0001>

<bundles_post_ra>
// kernel: tpu_custom_call.1
= control target key start
LH: loop header
LB: loop body
LE: loop exit
PB: predicated region body
PF: predicated region fallthrough
CT: control target
= control target key end

     0   :  { %14 = vsyncpa [#allocation3], 0  ;;  %s765_s0 = inlined_call_operand.hbm [shape: f32[16,128], index: 0, kind: input, shape index: {}]   ;;  %s766_s1 = inlined_call_operand.vmem [shape: f32[1,128], index: 1, kind: input, shape index: {}]   ;;  %s767_s2 = inlined_call_operand.vmem [shape: f32[1,128], index: 2, kind: input, shape index: {}]   ;;  %s768_s3 = inlined_call_operand.hbm [shape: bf16[128,128], index: 3, kind: input, shape index: {}]   ;;  %s769_s4 = inlined_call_operand.vmem [shape: f32[1,128], index: 4, kind: input, shape index: {}]   ;;  %s770_s5 = inlined_call_operand.hbm [shape: bf16[128,128], index: 5, kind: input, shape index: {}]   ;;  %s771_s6 = inlined_call_operand.vmem [shape: f32[1,128], index: 6, kind: input, shape index: {}]   ;;  %s772_s7 = inlined_call_operand.vmem [shape: f32[1,128], index: 7, kind: input, shape index: {}]   ;;  %s773_s8 = inlined_call_operand.vmem [shape: f32[1,128], index: 8, kind: input, shape index: {}]   ;;  %s774_s9 = inlined_call_operand.hbm [shape: f32[16,128], index: 9, kind: output, shape index: {}]  }
   0x1   :  { %15 = vsyncpa [#allocation6], 0 }
   0x2   :  { %16 = vsyncpa [#allocation4], 0  ;;  %s640_s30 = smov [#allocation5]  }
   0x3   :  { %s38_s10 = sshll.u32 %s640_s30, 4  ;;  %s39_s10 = int_to_ptr.vmem [resolvable:$true] %s38_s10 }
   0x4   :  { %s562_s11 = scalar_lea.vmem %s39_s10, 1024  ;;  %p567_p1 = scmp.lt.s32.totalorder %s39_s10, %s39_s10 }
   0x5   :  { %p563_p0 = scmp.ne.s32.totalorder %s39_s10, %s562_s11  ;;  %p568_p2 = scmp.lt.s32.totalorder %s562_s11, %s562_s11 }
   0x7   :  { %p569_p3 = por %p568_p2, %p567_p1 }
   0x9   :  { %p570_p4 = pnand %p569_p3, %p563_p0 }
   0xb   :  { %573 = shalt.err (!%p570_p4)
}
   0xc   :  { %s641_s12 = smov 64   ;;  %s642_s13 = smov 4  }
   0xd   :  { %44 = dma.hbm_to_vmem [thread:$0]  %s768_s3, 1024, %s39_s10, [#allocation6], %s641_s12, %s641_s12, %s642_s13  }
   0xe   :  { %s643_s16 = smov [#allocation2]  }
   0xf   :  { %s22_s17 = sshll.u32 %s643_s16, 4  ;;  %s23_s17 = int_to_ptr.vmem [resolvable:$true] %s22_s17 }
  0x10   :  { %s582_s18 = scalar_lea.vmem %s23_s17, 256  ;;  %p587_p6 = scmp.lt.s32.totalorder %s23_s17, %s23_s17 }
  0x11   :  { %p583_p5 = scmp.ne.s32.totalorder %s23_s17, %s582_s18  ;;  %p588_p7 = scmp.lt.s32.totalorder %s582_s18, %s582_s18 }
  0x13   :  { %p589_p8 = por %p588_p7, %p587_p6 }
  0x15   :  { %p590_p9 = pnand %p589_p8, %p583_p5 }
  0x17   :  { %593 = shalt.err (!%p590_p9)
}
  0x18   :  { %s644_s19 = smov 128   ;;  %s645_s20 = smov 8  }
  0x19   :  { %28 = dma.hbm_to_vmem [thread:$0]  %s765_s0, 256, %s23_s17, [#allocation3], %s644_s19, %s644_s19, %s645_s20  }
  0x1a   :  { %s646_s3 = smov [#allocation7]  }
  0x1b   :  { %s52_s23 = sshll.u32 %s646_s3, 4  ;;  %s53_s23 = int_to_ptr.vmem [resolvable:$true] %s52_s23 }
  0x1c   :  { %s602_s24 = scalar_lea.vmem %s53_s23, 1024  ;;  %p607_p11 = scmp.lt.s32.totalorder %s53_s23, %s53_s23 }
  0x1d   :  { %p603_p10 = scmp.ne.s32.totalorder %s53_s23, %s602_s24  ;;  %p608_p12 = scmp.lt.s32.totalorder %s602_s24, %s602_s24 }
  0x1f   :  { %p609_p13 = por %p608_p12, %p607_p11 }
  0x21   :  { %p610_p0 = pnand %p609_p13, %p603_p10 }
  0x23   :  { %613 = shalt.err (!%p610_p0)
}
  0x24   :  { %58 = dma.hbm_to_vmem [thread:$0]  %s770_s5, 1024, %s53_s23, [#allocation6], %s641_s12, %s641_s12, %s642_s13  }
  0x25   :  { %634 = dma.done.wait [#allocation3], 256  }
  0x26   :  { %635 = vsyncadd [#allocation3], 4294967040 }
  0x27   :  { %636 = dma.done.wait [#allocation6], 2048  }
  0x28   :  { %637 = vsyncadd [#allocation6], 4294965248  ;;  %v75_v0 = vld [vmem:[#allocation2] sm:$0xff]  ;;  %v76_v1 = vld [vmem:[#allocation2 + $0x8] sm:$0xff]  ;;  %v647_v3 = vmov 0.0   ;;  %v87_v4 = vlaneseq  ;;  %vm648_vm1 = vmmov 0  }
  0x29   :  { %79 = vadd.xlane.f32.xlu0 %v75_v0  ;;  %v522_v2 = vld [vmem:[#allocation5 + $0x38] sm:$0xff]   ;;  %472 = vmatprep.subr.bf16.mxu0 %v647_v3  ;;  %v523_v16 = vld [vmem:[#allocation5 + $0x30] sm:$0xff]   ;;  %v524_v17 = vld [vmem:[#allocation5 + $0x28] sm:$0xff]   ;;  %s649_s12 = smov [#allocation8]  }
  0x2a   :  { %492 = vmatprep.subr.bf16.mxu1 %v647_v3  ;;  %473 = vmatpush3.bf16.msra.mxu0 %v522_v2  ;;  %v715_v5 = vand.u32 127, %v87_v4  ;;  %v525_v18 = vld [vmem:[#allocation5 + $0x20] sm:$0xff]   ;;  %v526_v19 = vld [vmem:[#allocation5 + $0x18] sm:$0xff]   ;;  %v527_v20 = vld [vmem:[#allocation5 + $0x10] sm:$0xff]   ;;  %s419_s13 = sshll.u32 %s649_s12, 4  ;;  %s420_s13 = int_to_ptr.vmem [resolvable:$true] %s419_s13 }
  0x2b   :  { %474 = vmatprep.subr.bf16.mxu0 %v647_v3  ;;  %488 = vmatprep.mubr.msk.bf16.mxu0 %vm648_vm1, %v647_v3  ;;  %v528_v21 = vld [vmem:[#allocation5 + $0x8] sm:$0xff]   ;;  %v529_v22 = vld [vmem:[#allocation5] sm:$0xff]   ;;  %v530_v23 = vld [vmem:[#allocation7 + $0x38] sm:$0xff]   ;;  %s614_s14 = scalar_lea.vmem %s420_s13, 256  ;;  %p619_p2 = scmp.lt.s32.totalorder %s420_s13, %s420_s13 }
  0x2c   :  { %vm89_vm0 = vcmp.lt.s32.totalorder %v715_v5, 32  ;;  %508 = vmatprep.mubr.msk.bf16.mxu1 %vm648_vm1, %v647_v3  ;;  %493 = vmatpush3.bf16.msra.mxu1 %v530_v23  ;;  %v432_v32 = vld [vmem:[%s766_s1] ss:$0 sm:$0xff]  ;;  %v532_v42 = vld [vmem:[#allocation7 + $0x28] sm:$0xff]   ;;  %v533_v43 = vld [vmem:[#allocation7 + $0x20] sm:$0xff]   ;;  %p615_p1 = scmp.ne.s32.totalorder %s420_s13, %s614_s14  ;;  %p620_p3 = scmp.lt.s32.totalorder %s614_s14, %s614_s14 }
  0x2d   :  { %81 = vadd.xlane.f32.xlu0 %v76_v1  ;;  %494 = vmatprep.subr.bf16.mxu1 %v647_v3  ;;  %v433_v36 = vld [vmem:[%s767_s2] ss:$0 sm:$0xff]  ;;  %v534_v44 = vld [vmem:[#allocation7 + $0x18] sm:$0xff]   ;;  %v536_v46 = vld [vmem:[#allocation7 + $0x8] sm:$0xff]  }
  0x2e   :  { %475 = vmatpush3.bf16.msra.mxu0 %v523_v16  ;;  %v531_v41 = vld [vmem:[#allocation7 + $0x30] sm:$0xff]   ;;  %v537_v47 = vld [vmem:[#allocation7] sm:$0xff]   ;;  %p621_p4 = por %p620_p3, %p619_p2 }
  0x2f   :  { %476 = vmatprep.subr.bf16.mxu0 %v647_v3  ;;  %v535_v45 = vld [vmem:[#allocation7 + $0x10] sm:$0xff]  }
  0x30   :  { %495 = vmatpush3.bf16.msra.mxu1 %v531_v41  ;;  %v434_v48 = vld [vmem:[%s769_s4] ss:$0 sm:$0xff]  ;;  %p622_p5 = pnand %p621_p4, %p615_p1 }
  0x31   :  { %496 = vmatprep.subr.bf16.mxu1 %v647_v3  ;;  %v443_v2 = vld [vmem:[%s771_s6] ss:$0 sm:$0xff] }
  0x32   :  { %477 = vmatpush3.bf16.msra.mxu0 %v524_v17  ;;  %v453_v5 = vld [vmem:[%s773_s8] ss:$0 sm:$0xff] }
  0x33   :  { %478 = vmatprep.subr.bf16.mxu0 %v647_v3 }
  0x34   :  { %497 = vmatpush3.bf16.msra.mxu1 %v532_v42 }
  0x35   :  { %498 = vmatprep.subr.bf16.mxu1 %v647_v3 }
  0x36   :  { %479 = vmatpush3.bf16.msra.mxu0 %v525_v18 }
  0x37   :  { %480 = vmatprep.subr.bf16.mxu0 %v647_v3 }
  0x38   :  { %499 = vmatpush3.bf16.msra.mxu1 %v533_v43 }
  0x39   :  { %500 = vmatprep.subr.bf16.mxu1 %v647_v3 }
  0x3a   :  { %481 = vmatpush3.bf16.msra.mxu0 %v526_v19 }
  0x3b   :  { %482 = vmatprep.subr.bf16.mxu0 %v647_v3 }
  0x3c   :  { %501 = vmatpush3.bf16.msra.mxu1 %v534_v44 }
  0x3d   :  { %502 = vmatprep.subr.bf16.mxu1 %v647_v3 }
  0x3e   :  { %483 = vmatpush3.bf16.msra.mxu0 %v527_v20 }
  0x3f   :  { %484 = vmatprep.subr.bf16.mxu0 %v647_v3 }
  0x40   :  { %503 = vmatpush3.bf16.msra.mxu1 %v535_v45 }
  0x41   :  { %504 = vmatprep.subr.bf16.mxu1 %v647_v3 }
  0x42   :  { %485 = vmatpush3.bf16.msra.mxu0 %v528_v21 }
  0x43   :  { %486 = vmatprep.subr.bf16.mxu0 %v647_v3 }
  0x44   :  { %505 = vmatpush3.bf16.msra.mxu1 %v536_v46 }
  0x45   :  { %506 = vmatprep.subr.bf16.mxu1 %v647_v3 }
  0x46   :  { %487 = vmatpush3.bf16.msra.mxu0 %v529_v22 }
  0x48   :  { %507 = vmatpush3.bf16.msra.mxu1 %v537_v47 }
  0xb2   :  { %v80_v6 = vpop.xlane.xlu0 %79 }
  0xb3   :  { %v83_v7 = vmul.f32 0.03125, %v80_v6 }
  0xb5   :  { %v85_v8 = vsub.f32 %v75_v0, %v83_v7 }
  0xb6   :  { %v82_v9 = vpop.xlane.xlu0 %81 }
  0xb7   :  { %v84_v10 = vmul.f32 0.03125, %v82_v9  ;;  %v92_v11 = vsel %vm89_vm0, %v85_v8, 0.0 }
  0xb8   :  { %v94_v12 = vmul.f32 %v92_v11, %v92_v11 }
  0xb9   :  { %v86_v13 = vsub.f32 %v76_v1, %v84_v10 }
  0xba   :  { %96 = vadd.xlane.f32.xlu1 %v94_v12 }
  0xbb   :  { %v93_v14 = vsel %vm89_vm0, %v86_v13, 0.0 }
  0xbc   :  { %v95_v15 = vmul.f32 %v93_v14, %v93_v14 }
  0xbe   :  { %98 = vadd.xlane.f32.xlu1 %v95_v15 }
 0x143   :  { %v97_v24 = vpop.xlane.xlu1 %96 }
 0x144   :  { %v100_v25 = vmul.f32 0.03125, %v97_v24 }
 0x146   :  { %v102_v26 = vadd.f32 1e-05, %v100_v25 }
 0x147   :  { %v99_v27 = vpop.xlane.xlu1 %98 }
 0x148   :  { %538 = vrsqrt.f32 %v102_v26  ;;  %v101_v28 = vmul.f32 0.03125, %v99_v27 }
 0x14a   :  { %v103_v29 = vadd.f32 1e-05, %v101_v28 }
 0x14c   :  { %540 = vrsqrt.f32 %v103_v29 }
 0x155   :  { %v539_v30 = vpop.eup %538 }
 0x156   :  { %v106_v31 = vmul.f32 %v539_v30, %v92_v11 }
 0x158   :  { %v114_v35 = vmul.f32 %v432_v32, %v106_v31 }
 0x159   :  { %v541_v33 = vpop.eup %540 }
 0x15a   :  { %v107_v34 = vmul.f32 %v541_v33, %v93_v14  ;;  %v122_v38 = vadd.f32 %v433_v36, %v114_v35 }
 0x15c   :  { %v115_v37 = vmul.f32 %v432_v32, %v107_v34 }
 0x15e   :  { %v123_v39 = vadd.f32 %v433_v36, %v115_v37  ;;  %v452_v37 = vld [vmem:[%s772_s7] ss:$0 sm:$0xff] }
 0x160   :  { %v141_v40 = vpack.c.bf16 %v123_v39, %v122_v38 }
 0x162   :  { %489 = vmatmul.mubr.bf16.vlgmr.msra.gmra.mxu0 %v141_v40 }
 0x222   :  { %v230_v49 = vpop.f32.mrf.mxu0 }
 0x223   :  { %v231_v50 = vadd.f32 %v434_v48, %v230_v49 }
 0x224   :  { %v490_v51 = vpop.f32.mrf.mxu0 }
 0x225   :  { %v239_v52 = vmul.f32 0.70710677, %v231_v50  ;;  %v237_v60 = vmul.f32 0.5, %v231_v50 }
 0x226   :  { %v233_v53 = vpop.f32.mrf.mxu0 }
 0x227   :  { %542 = verf.f32 %v239_v52  ;;  %v234_v54 = vadd.f32 %v434_v48, %v233_v53 }
 0x228   :  { %v491_v55 = vpop.f32.mrf.mxu0 }
 0x229   :  { %v240_v56 = vmul.f32 0.70710677, %v234_v54  ;;  %v238_v61 = vmul.f32 0.5, %v234_v54 }
 0x22b   :  { %544 = verf.f32 %v240_v56 }
 0x234   :  { %v543_v57 = vpop.eup %542 }
 0x235   :  { %v243_v58 = vadd.f32 1.0, %v543_v57 }
 0x237   :  { %v245_v63 = vmul.f32 %v243_v58, %v237_v60 }
 0x238   :  { %v545_v59 = vpop.eup %544 }
 0x239   :  { %v244_v62 = vadd.f32 1.0, %v545_v59 }
 0x23b   :  { %v246_v0 = vmul.f32 %v244_v62, %v238_v61 }
 0x23d   :  { %v264_v1 = vpack.c.bf16 %v246_v0, %v245_v63 }
 0x23f   :  { %509 = vmatmul.mubr.bf16.vlgmr.msra.gmra.mxu1 %v264_v1 }
 0x2ff   :  { %v353_v3 = vpop.f32.mrf.mxu1 }
 0x300   :  { %v354_v4 = vadd.f32 %v443_v2, %v353_v3 }
 0x301   :  { %v510_v6 = vpop.f32.mrf.mxu1 }
 0x302   :  { %v362_v7 = vmul.f32 0.70710677, %v354_v4  ;;  %v360_v13 = vmul.f32 0.5, %v354_v4 }
 0x303   :  { %v356_v8 = vpop.f32.mrf.mxu1 }
 0x304   :  { %546 = verf.f32 %v362_v7  ;;  %v357_v9 = vadd.f32 %v443_v2, %v356_v8 }
 0x305   :  { %v511_v10 = vpop.f32.mrf.mxu1 }
 0x306   :  { %v363_v11 = vmul.f32 0.70710677, %v357_v9  ;;  %v361_v17 = vmul.f32 0.5, %v357_v9 }
 0x308   :  { %548 = verf.f32 %v363_v11 }
 0x311   :  { %v547_v12 = vpop.eup %546 }
 0x312   :  { %v366_v14 = vadd.f32 1.0, %v547_v12 }
 0x314   :  { %v368_v15 = vmul.f32 %v366_v14, %v360_v13 }
 0x315   :  { %v549_v16 = vpop.eup %548 }
 0x316   :  { %372 = vadd.xlane.f32.xlu0 %v368_v15  ;;  %v367_v18 = vadd.f32 1.0, %v549_v16 }
 0x318   :  { %v369_v19 = vmul.f32 %v367_v18, %v361_v17 }
 0x31a   :  { %374 = vadd.xlane.f32.xlu1 %v369_v19 }
 0x39f   :  { %v373_v20 = vpop.xlane.xlu0 %372 }
 0x3a0   :  { %v376_v21 = vmul.f32 0.03125, %v373_v20 }
 0x3a2   :  { %v378_v22 = vsub.f32 %v368_v15, %v376_v21 }
 0x3a3   :  { %v375_v23 = vpop.xlane.xlu1 %374 }
 0x3a4   :  { %v377_v24 = vmul.f32 0.03125, %v375_v23  ;;  %v380_v25 = vsel %vm89_vm0, %v378_v22, 0.0 }
 0x3a5   :  { %v382_v26 = vmul.f32 %v380_v25, %v380_v25 }
 0x3a6   :  { %v379_v27 = vsub.f32 %v369_v19, %v377_v24 }
 0x3a7   :  { %384 = vadd.xlane.f32.xlu0 %v382_v26 }
 0x3a8   :  { %v381_v28 = vsel %vm89_vm0, %v379_v27, 0.0 }
 0x3a9   :  { %v383_v29 = vmul.f32 %v381_v28, %v381_v28 }
 0x3ab   :  { %386 = vadd.xlane.f32.xlu1 %v383_v29 }
 0x430   :  { %v385_v30 = vpop.xlane.xlu0 %384 }
 0x431   :  { %v388_v31 = vmul.f32 0.03125, %v385_v30 }
 0x433   :  { %v390_v32 = vadd.f32 1e-05, %v388_v31 }
 0x434   :  { %v387_v33 = vpop.xlane.xlu1 %386 }
 0x435   :  { %550 = vrsqrt.f32 %v390_v32  ;;  %v389_v34 = vmul.f32 0.03125, %v387_v33 }
 0x437   :  { %v391_v35 = vadd.f32 1e-05, %v389_v34 }
 0x439   :  { %552 = vrsqrt.f32 %v391_v35 }
 0x442   :  { %v551_v36 = vpop.eup %550 }
 0x443   :  { %v394_v38 = vmul.f32 %v551_v36, %v380_v25 }
 0x445   :  { %v402_v39 = vmul.f32 %v452_v37, %v394_v38 }
 0x446   :  { %v553_v40 = vpop.eup %552 }
 0x447   :  { %v395_v41 = vmul.f32 %v553_v40, %v381_v28  ;;  %v410_v42 = vadd.f32 %v453_v5, %v402_v39 }
 0x449   :  { %v403_v43 = vmul.f32 %v452_v37, %v395_v41  ;;  %412 = vst [vmem:[#allocation8] sm:$0xff] %v410_v42 }
 0x44b   :  { %v411_v44 = vadd.f32 %v453_v5, %v403_v43 }
 0x44d   :  { %413 = vst [vmem:[#allocation8 + $0x8] sm:$0xff] %v411_v44 }
 0x44e   :  { %625 = shalt.err (!%p622_p5)
}
 0x44f   :  { %425 = dma.vmem_to_hbm [thread:$0]  %s420_s13, 256, %s774_s9, [#allocation4], %s644_s19, %s644_s19, %s645_s20  }
 0x450   :  { %638 = dma.done.wait [#allocation4], 256  }
 0x451   :  { %639 = vsyncadd [#allocation4], 4294967040 }
 0x452   :  { %429 = vsyncpa [#allocation3], 1 }
 0x453   :  { %430 = vsyncpa [#allocation6], 1 }
 0x454   :  { %431 = vsyncpa [#allocation4], 1 }

</bundles_post_ra>
